<compile_context>
chip_gen: v5e
topology: v5e:2x2
jax: 0.10.0
libtpu: 0.0.40
codegen_flags: <defaults>
</compile_context>

<pallas_src>
import functools

import jax
import jax.numpy as jnp
from jax import lax
from jax.experimental import pallas as pl
from jax.experimental.pallas import tpu as pltpu

_LANES = 128
_ACC_ROWS = 8          # accumulator sublanes (one f32 vreg worth of rows)
_CHUNK_ROWS = 256      # rows per in-kernel sub-chunk
_VMEM_LIMIT = 32 * 1024 * 1024


def _round_up(x, m):
    return ((x + m - 1) // m) * m


def _sublane_pack(dtype):
    """Row alignment required by sublane packing: 8 (32-bit), 16 (16-bit), 32 (8-bit)."""
    itemsize = jnp.dtype(dtype).itemsize
    return 8 * max(1, 4 // itemsize)


def _make_wmse_kernel(tr, m_valid, needs_mask):
    """Build the kernel body for a (tr, 128) row tile; m_valid = valid rows."""
    # Static sub-chunk schedule (each chunk is a multiple of 8 rows).
    chunks = []
    r = 0
    while r < tr:
        cr = min(_CHUNK_ROWS, tr - r)
        chunks.append((r, cr))
        r += cr

    def kernel(o_ref, e_ref, w_ref, acc_ref):
        s = pl.program_id(0)

        @pl.when(s == 0)
        def _():
            acc_ref[...] = jnp.zeros_like(acc_ref)

        row0 = s * tr
        partial = jnp.zeros((_ACC_ROWS, _LANES), jnp.float32)
        for r_off, cr in chunks:
            o = o_ref[pl.ds(r_off, cr), :].astype(jnp.float32)
            e = e_ref[pl.ds(r_off, cr), :].astype(jnp.float32)
            w = w_ref[pl.ds(r_off, cr), :].astype(jnp.float32)
            d = o - e
            contrib = d * d * w  # pure VPU elementwise work
            if needs_mask:
                # Mask rows beyond the valid range (garbage from the partial
                # last block).  Applied to `contrib`, so the mean divisor
                # (original element count) is unaffected.
                local_row = lax.broadcasted_iota(jnp.int32, (cr, _LANES), 0)
                valid = (row0 + r_off + local_row) < m_valid
                contrib = jnp.where(valid, contrib, jnp.float32(0.0))
            # Fold the chunk into the vreg-shaped (8, 128) partial sum:
            # elementwise adds of distinct vregs only; the cross-lane/sublane
            # scalar reduce happens once in the wrapper.
            partial = partial + contrib.reshape(
                cr // _ACC_ROWS, _ACC_ROWS, _LANES).sum(axis=0)
        acc_ref[...] += partial

    return kernel


def _prepare_2d(x, pack):
    """Flatten x row-major to (rows, 128); pad only up to a pack*128 multiple."""
    n = x.size
    flat = x.reshape(-1)
    n_pad = _round_up(n, pack * _LANES)
    if n_pad != n:
        # Zero pad -> zero contribution; divisor stays the original count.
        flat = jnp.pad(flat, (0, n_pad - n))
    return flat.reshape(n_pad // _LANES, _LANES)


def _wmse_from_2d(o2, e2, w2, n_total, out_dtype, tile_rows):
    """Run the Pallas kernel on pre-shaped (m, 128) inputs."""
    m = o2.shape[0]
    pack = max(_sublane_pack(o2.dtype), _sublane_pack(e2.dtype),
               _sublane_pack(w2.dtype))
    tr = min(_round_up(tile_rows, pack), m)        # m is a multiple of pack
    steps = pl.cdiv(m, tr)
    needs_mask = (m % tr) != 0                     # only the last tile is partial

    in_spec = pl.BlockSpec((tr, _LANES), lambda s: (s, 0))
    # Output block index independent of the reduction step -> VMEM-resident
    # accumulator across the whole grid.
    out_spec = pl.BlockSpec((_ACC_ROWS, _LANES), lambda s: (0, 0))

    acc = pl.pallas_call(
        _make_wmse_kernel(tr, m, needs_mask),
        out_shape=jax.ShapeDtypeStruct((_ACC_ROWS, _LANES), jnp.float32),
        grid_spec=pltpu.PrefetchScalarGridSpec(
            num_scalar_prefetch=0,
            grid=(steps,),
            in_specs=[in_spec, in_spec, in_spec],
            out_specs=out_spec,
        ),
        compiler_params=pltpu.CompilerParams(
            dimension_semantics=("arbitrary",),
            vmem_limit_bytes=_VMEM_LIMIT,
        ),
    )(o2, e2, w2)

    total = jnp.sum(acc)  # final cross-lane/sublane reduce (once, in wrapper)
    return (total / jnp.float32(n_total)).astype(out_dtype)


def weighted_mse_loss(tno, tne, tnw, *, tile_rows=4096):
    """Pallas implementation of torch.mean((tno - tne)**2 * tnw)."""
    assert tno.shape == tne.shape == tnw.shape, "weight must match tensor shape"
    n_total = tno.size
    out_dtype = jnp.result_type(tno.dtype, tne.dtype, tnw.dtype)
    if n_total == 0:
        return jnp.full((), jnp.nan, dtype=out_dtype)  # matches torch.mean(empty)

    pack = max(_sublane_pack(tno.dtype), _sublane_pack(tne.dtype),
               _sublane_pack(tnw.dtype))
    o2 = _prepare_2d(tno, pack)
    e2 = _prepare_2d(tne, pack)
    w2 = _prepare_2d(tnw, pack)
    return _wmse_from_2d(o2, e2, w2, n_total, out_dtype, tile_rows)


def _wmse_with_prepared_weight(tno, tne, w2, *, tile_rows):
    """Forward pass when the weight has already been shaped to (m_pad, 128)."""
    n_total = tno.size
    out_dtype = jnp.result_type(tno.dtype, tne.dtype, w2.dtype)
    pack = max(_sublane_pack(tno.dtype), _sublane_pack(tne.dtype),
               _sublane_pack(w2.dtype))
    o2 = _prepare_2d(tno, pack)
    e2 = _prepare_2d(tne, pack)
    assert o2.shape == w2.shape, "prepared weight does not match input padding"
    return _wmse_from_2d(o2, e2, w2, n_total, out_dtype, tile_rows)


class WeightedMSELoss:
    """Mirror of the PyTorch module: binds a weight buffer at construction.

    The constant weight is flattened / padded / reshaped once here, and the
    forward pass (activation reshape + Pallas reduction) is jitted.
    """

    def __init__(self, weight, *, tile_rows=4096):
        self.weight = weight
        self.tile_rows = tile_rows
        self._w2_cache = {}                               # n_pad -> (m_pad, 128) weight
        self._get_w2(_sublane_pack(weight.dtype))         # pre-shape for the common case
        self._jitted = jax.jit(functools.partial(
            _wmse_with_prepared_weight, tile_rows=tile_rows))

    def _get_w2(self, pack):
        n_pad = _round_up(self.weight.size, pack * _LANES)
        if n_pad not in self._w2_cache:
            self._w2_cache[n_pad] = _prepare_2d(self.weight, pack)
        return self._w2_cache[n_pad]

    def __call__(self, tno, tne):
        assert tno.shape == tne.shape == self.weight.shape
        out_dtype = jnp.result_type(tno.dtype, tne.dtype, self.weight.dtype)
        if tno.size == 0:
            return jnp.full((), jnp.nan, dtype=out_dtype)
        pack = max(_sublane_pack(tno.dtype), _sublane_pack(tne.dtype),
                   _sublane_pack(self.weight.dtype))
        w2 = self._get_w2(pack)
        return self._jitted(tno, tne, w2)


if __name__ == "__main__":
    key = jax.random.PRNGKey(0)
    k1, k2, k3 = jax.random.split(key, 3)

    # Module path (pre-shaped weight, jitted forward): batch=2, ch=4, 16x16.
    shape = (2, 4, 16, 16)
    tno = jax.random.normal(k1, shape, dtype=jnp.float32)
    tne = jax.random.normal(k2, shape, dtype=jnp.float32)
    weight = jax.random.uniform(k3, shape, dtype=jnp.float32)

    loss_mod = WeightedMSELoss(weight)
    loss = jax.block_until_ready(loss_mod(tno, tne))
    ref = jnp.mean((tno - tne) ** 2 * weight)
    assert jnp.allclose(loss, ref, rtol=1e-5, atol=1e-6), (loss, ref)

    # Ragged size (exercises the small zero-pad path).
    shape2 = (3, 5, 7)
    a2 = jax.random.normal(k1, shape2, dtype=jnp.float32)
    b2 = jax.random.normal(k2, shape2, dtype=jnp.float32)
    w2 = jax.random.uniform(k3, shape2, dtype=jnp.float32)
    loss2 = jax.block_until_ready(weighted_mse_loss(a2, b2, w2))
    ref2 = jnp.mean((a2 - b2) ** 2 * w2)
    assert jnp.allclose(loss2, ref2, rtol=1e-5, atol=1e-6), (loss2, ref2)

    # Partial last row-tile (exercises the in-kernel mask path): 40 rows, tr=16.
    shape3 = (40, 128)
    a3 = jax.random.normal(k1, shape3, dtype=jnp.float32)
    b3 = jax.random.normal(k2, shape3, dtype=jnp.float32)
    w3 = jax.random.uniform(k3, shape3, dtype=jnp.float32)
    loss3 = jax.block_until_ready(weighted_mse_loss(a3, b3, w3, tile_rows=16))
    ref3 = jnp.mean((a3 - b3) ** 2 * w3)
    assert jnp.allclose(loss3, ref3, rtol=1e-5, atol=1e-6), (loss3, ref3)

    print("KERNEL_OK")
</pallas_src>

<mosaic_0001>
module attributes {stable_mosaic.version = 11 : i64} {
  func.func @kernel(%arg0: i32, %arg1: memref<16x128xf32, #tpu.memory_space<vmem>>, %arg2: memref<16x128xf32, #tpu.memory_space<vmem>>, %arg3: memref<16x128xf32, #tpu.memory_space<vmem>>, %arg4: memref<8x128xf32, #tpu.memory_space<vmem>>) attributes {dimension_semantics = [#tpu.dimension_semantics<arbitrary>], iteration_bounds = array<i64: 1>, scalar_prefetch = 0 : i64, scratch_operands = 0 : i64, tpu.core_type = #tpu.core_type<tc>, window_params = [{transform_indices = @transform_0, window_bounds = array<i64: 16, 128>}, {transform_indices = @transform_1, window_bounds = array<i64: 16, 128>}, {transform_indices = @transform_2, window_bounds = array<i64: 16, 128>}, {pipeline_mode = #tpu.pipeline_mode<synchronous>, transform_indices = @transform_3, window_bounds = array<i64: 8, 128>}]} {
    %c0_i32 = arith.constant 0 : i32
    %0 = arith.cmpi eq, %arg0, %c0_i32 : i32
    %1 = arith.extui %0 : i1 to i32
    %c0_i32_0 = arith.constant 0 : i32
    %2 = arith.cmpi ne, %1, %c0_i32_0 : i32
    scf.if %2 {
      %cst_11 = arith.constant 0.000000e+00 : f32
      %16 = vector.broadcast %cst_11 : f32 to vector<8x128xf32>
      %c0_12 = arith.constant 0 : index
      %c0_13 = arith.constant 0 : index
      %17 = vector.load %arg4[%c0_12, %c0_13] : memref<8x128xf32, #tpu.memory_space<vmem>>, vector<8x128xf32>
      tpu.vector_store %arg4[%c0_12, %c0_13], %16 {strides = array<i32>} : memref<8x128xf32, #tpu.memory_space<vmem>>, vector<8x128xf32>,
    } else {
    }
    %cst = arith.constant 0.000000e+00 : f32
    %3 = vector.broadcast %cst : f32 to vector<8x128xf32>
    %c0 = arith.constant 0 : index
    %c0_1 = arith.constant 0 : index
    %4 = vector.load %arg1[%c0, %c0_1] : memref<16x128xf32, #tpu.memory_space<vmem>>, vector<16x128xf32>
    %c0_2 = arith.constant 0 : index
    %c0_3 = arith.constant 0 : index
    %5 = vector.load %arg2[%c0_2, %c0_3] : memref<16x128xf32, #tpu.memory_space<vmem>>, vector<16x128xf32>
    %c0_4 = arith.constant 0 : index
    %c0_5 = arith.constant 0 : index
    %6 = vector.load %arg3[%c0_4, %c0_5] : memref<16x128xf32, #tpu.memory_space<vmem>>, vector<16x128xf32>
    %7 = arith.subf %4, %5 : vector<16x128xf32>
    %8 = arith.mulf %7, %7 : vector<16x128xf32>
    %9 = arith.mulf %8, %6 : vector<16x128xf32>
    %10 = vector.shape_cast %9 : vector<16x128xf32> to vector<2x8x128xf32>
    %cst_6 = arith.constant dense<0.000000e+00> : vector<8x128xf32>
    %11 = vector.multi_reduction <add>, %10, %cst_6 [0] : vector<2x8x128xf32> to vector<8x128xf32>
    %12 = arith.addf %3, %11 : vector<8x128xf32>
    %c0_7 = arith.constant 0 : index
    %c0_8 = arith.constant 0 : index
    %13 = vector.load %arg4[%c0_7, %c0_8] : memref<8x128xf32, #tpu.memory_space<vmem>>, vector<8x128xf32>
    %14 = arith.addf %13, %12 : vector<8x128xf32>
    %c0_9 = arith.constant 0 : index
    %c0_10 = arith.constant 0 : index
    %15 = vector.load %arg4[%c0_9, %c0_10] : memref<8x128xf32, #tpu.memory_space<vmem>>, vector<8x128xf32>
    tpu.vector_store %arg4[%c0_9, %c0_10], %14 {strides = array<i32>} : memref<8x128xf32, #tpu.memory_space<vmem>>, vector<8x128xf32>,
    return
  }
  func.func @transform_0(%arg0: i32) -> (i32, i32) {
    %c0_i32 = arith.constant 0 : i32
    %c0_i32_0 = arith.constant 0 : i32
    return %arg0, %c0_i32 : i32, i32
  }
  func.func @transform_1(%arg0: i32) -> (i32, i32) {
    %c0_i32 = arith.constant 0 : i32
    %c0_i32_0 = arith.constant 0 : i32
    return %arg0, %c0_i32 : i32, i32
  }
  func.func @transform_2(%arg0: i32) -> (i32, i32) {
    %c0_i32 = arith.constant 0 : i32
    %c0_i32_0 = arith.constant 0 : i32
    return %arg0, %c0_i32 : i32, i32
  }
  func.func @transform_3(%arg0: i32) -> (i32, i32) {
    %c0_i32 = arith.constant 0 : i32
    %c0_i32_0 = arith.constant 0 : i32
    %c0_i32_1 = arith.constant 0 : i32
    return %c0_i32, %c0_i32_0 : i32, i32
  }
}

</mosaic_0001>

<bundles_post_ra>
// kernel: _wmse_with_prepared_weight.1
= control target key start
LH: loop header
LB: loop body
LE: loop exit
PB: predicated region body
PF: predicated region fallthrough
CT: control target
= control target key end

     0   :  { %s82_s0 = inlined_call_operand.vmem [shape: f32[16,128], index: 0, kind: input, shape index: {}]   ;;  %s83_s1 = inlined_call_operand.vmem [shape: f32[16,128], index: 1, kind: input, shape index: {}]   ;;  %s84_s2 = inlined_call_operand.vmem [shape: f32[16,128], index: 2, kind: input, shape index: {}]   ;;  %s85_s3 = inlined_call_operand.vmem [shape: f32[8,128], index: 3, kind: output, shape index: {}]  }
   0x1   :  { %v19_v0 = vld [vmem:[%s82_s0] sm:$0xff]  ;;  %v20_v1 = vld [vmem:[%s82_s0 + $0x8] sm:$0xff] }
   0x2   :  { %v21_v2 = vld [vmem:[%s83_s1] sm:$0xff]  ;;  %v22_v3 = vld [vmem:[%s83_s1 + $0x8] sm:$0xff] }
   0x3   :  { %v25_v4 = vsub.f32 %v19_v0, %v21_v2  ;;  %v23_v5 = vld [vmem:[%s84_s2] sm:$0xff]  ;;  %v26_v6 = vsub.f32 %v20_v1, %v22_v3  ;;  %v24_v7 = vld [vmem:[%s84_s2 + $0x8] sm:$0xff] }
   0x5   :  { %v27_v8 = vmul.f32 %v25_v4, %v25_v4  ;;  %v28_v9 = vmul.f32 %v26_v6, %v26_v6 }
   0x7   :  { %v29_v10 = vmul.f32 %v27_v8, %v23_v5  ;;  %v30_v11 = vmul.f32 %v28_v9, %v24_v7 }
   0x9   :  { %v31_v12 = vadd.f32 %v30_v11, %v29_v10 }
   0xb   :  { %35 = vst [vmem:[%s85_s3] sm:$0xff] %v31_v12 }

</bundles_post_ra>
